<compile_context>
chip_gen: v5e
topology: v5e:2x2
jax: 0.10.0
libtpu: 0.0.40
codegen_flags: <defaults>
</compile_context>

<pallas_src>
import functools

import jax
import jax.numpy as jnp
from jax import lax
from jax.experimental import pallas as pl
from jax.experimental.pallas import tpu as pltpu


# ----------------------------------------------------------------------------
# Pallas kernel: y = x @ W^T + b   (the nn.Linear hot path)
# ----------------------------------------------------------------------------
def _linear_kernel(x_ref, w_ref, b_ref, o_ref):
    """x_ref: (N, tk), w_ref: (O, tk) native nn.Linear layout, o_ref: (N, O)."""
    k = pl.program_id(0)

    @pl.when(k == 0)
    def _():
        # Initialize the (VMEM-resident) output block with the bias.
        o_ref[...] = jnp.broadcast_to(b_ref[...], o_ref.shape)

    # Contract the last dims of x and W (i.e. x @ W^T) on the MXU, accumulating
    # in float32 directly into the output block (same block for every k).
    o_ref[...] += lax.dot_general(
        x_ref[...],
        w_ref[...],
        dimension_numbers=(((1,), (1,)), ((), ())),
        preferred_element_type=jnp.float32,
    )


def _pick_tk(K, max_tk=2048):
    """Largest multiple-of-128 divisor of K that is <= max_tk; else one step."""
    cand = (max_tk // 128) * 128
    while cand >= 128:
        if K % cand == 0:
            return cand
        cand -= 128
    return K  # K has no multiple-of-128 divisor: single full-K step.


@functools.partial(jax.jit, static_argnames=("max_tk",))
def linear_pallas(x, w, b, *, max_tk=2048):
    """x: (N, K) f32, w: (O, K) (PyTorch nn.Linear layout), b: (O,) -> (N, O)."""
    N, K = x.shape
    O, Kw = w.shape
    assert K == Kw, (K, Kw)
    tk = _pick_tk(K, max_tk)
    assert K % tk == 0, (K, tk)
    b2 = b.reshape(1, O)

    return pl.pallas_call(
        _linear_kernel,
        out_shape=jax.ShapeDtypeStruct((N, O), x.dtype),
        grid_spec=pltpu.PrefetchScalarGridSpec(
            num_scalar_prefetch=0,
            grid=(K // tk,),
            in_specs=[
                pl.BlockSpec((N, tk), lambda k: (0, k)),   # x tile over K
                pl.BlockSpec((O, tk), lambda k: (0, k)),   # W tile (native layout)
                pl.BlockSpec((1, O), lambda k: (0, 0)),    # bias (resident)
            ],
            out_specs=pl.BlockSpec((N, O), lambda k: (0, 0)),  # accumulator out
        ),
        compiler_params=pltpu.CompilerParams(
            dimension_semantics=("arbitrary",)  # K is a reduction axis
        ),
    )(x, w, b2)


# ----------------------------------------------------------------------------
# Plain-JAX glue mirroring the PyTorch module
# ----------------------------------------------------------------------------
def split_instances(data, way, shot, query, meta_batch_size):
    """Same semantics as the PyTorch slicing loop, as a reshape + static slice."""
    separate = shot * way
    task_size = (shot + query) * way
    data = data.reshape(meta_batch_size, task_size, *data.shape[1:])
    support = data[:, :separate]
    query_ = data[:, separate:]
    return support, query_


def linear_model_forward(instance_embs, prefix, params, args):
    """Mirrors Linear.forward (post-encoder part). Returns (logits, None)."""
    way, shot, query, mbs = (
        args["way"], args["shot"], args["query"], args["meta_batch_size"]
    )
    support, query_ = split_instances(instance_embs, way, shot, query, mbs)
    if prefix == "train_":
        feats = support.reshape(support.shape[1], -1)   # (way*shot, mbs*T*C)
    else:
        feats = query_.reshape(query_.shape[1], -1)     # (way*query, mbs*T*C)
    logits = linear_pallas(feats, params["cls_w"], params["cls_b"])
    return logits, None


# ----------------------------------------------------------------------------
# Main
# ----------------------------------------------------------------------------
if __name__ == "__main__":
    # Small, structure-preserving shapes (real model: T=29, C=2048, classes=5).
    args = dict(way=5, shot=1, query=2, meta_batch_size=1)
    T, C = 8, 64                         # per-instance embedding (T, C)
    num_classes = 5                      # hard-coded 5 in the PyTorch module
    in_features = args["meta_batch_size"] * T * C   # 512 (real: 2048*29)

    task_size = (args["shot"] + args["query"]) * args["way"]
    n_instances = args["meta_batch_size"] * task_size   # 15

    key = jax.random.PRNGKey(0)
    k_emb, k_w, k_b = jax.random.split(key, 3)

    # Post-encoder features (stand-in for Conv1dResNet / Conv3dResNet output).
    instance_embs = jax.random.normal(
        k_emb, (n_instances, T, C), dtype=jnp.float32
    )

    # Deterministic nn.Linear(in_features, 5) parameters (PyTorch layout).
    bound = 1.0 / (in_features ** 0.5)
    params = {
        "cls_w": jax.random.uniform(
            k_w, (num_classes, in_features), jnp.float32, -bound, bound
        ),
        "cls_b": jax.random.uniform(
            k_b, (num_classes,), jnp.float32, -bound, bound
        ),
    }

    # Run both branches of forward().
    train_logits, _ = linear_model_forward(instance_embs, "train_", params, args)
    test_logits, _ = linear_model_forward(instance_embs, "test_", params, args)
    jax.block_until_ready((train_logits, test_logits))

    # Reference check against plain-JAX math.
    support, query_ = split_instances(
        instance_embs, args["way"], args["shot"], args["query"],
        args["meta_batch_size"],
    )
    ref_train = (
        support.reshape(support.shape[1], -1) @ params["cls_w"].T + params["cls_b"]
    )
    ref_test = (
        query_.reshape(query_.shape[1], -1) @ params["cls_w"].T + params["cls_b"]
    )
    assert train_logits.shape == (args["way"] * args["shot"], num_classes)
    assert test_logits.shape == (args["way"] * args["query"], num_classes)
    assert jnp.allclose(train_logits, ref_train, atol=1e-4, rtol=1e-4)
    assert jnp.allclose(test_logits, ref_test, atol=1e-4, rtol=1e-4)

    print("KERNEL_OK")
</pallas_src>

<mosaic_0001>
module attributes {stable_mosaic.version = 11 : i64} {
  func.func @_linear_kernel(%arg0: i32, %arg1: memref<5x512xf32, #tpu.memory_space<vmem>>, %arg2: memref<5x512xf32, #tpu.memory_space<vmem>>, %arg3: memref<1x5xf32, #tpu.memory_space<vmem>>, %arg4: memref<5x5xf32, #tpu.memory_space<vmem>>) attributes {dimension_semantics = [#tpu.dimension_semantics<arbitrary>], iteration_bounds = array<i64: 1>, scalar_prefetch = 0 : i64, scratch_operands = 0 : i64, tpu.core_type = #tpu.core_type<tc>, window_params = [{transform_indices = @transform_0, window_bounds = array<i64: 5, 512>}, {transform_indices = @transform_1, window_bounds = array<i64: 5, 512>}, {pipeline_mode = #tpu.pipeline_mode<synchronous>, transform_indices = @transform_2, window_bounds = array<i64: 1, 5>}, {pipeline_mode = #tpu.pipeline_mode<synchronous>, transform_indices = @transform_3, window_bounds = array<i64: 5, 5>}]} {
    %c0_i32 = arith.constant 0 : i32
    %0 = arith.cmpi eq, %arg0, %c0_i32 : i32
    %1 = arith.extui %0 : i1 to i32
    %c0_i32_0 = arith.constant 0 : i32
    %2 = arith.cmpi ne, %1, %c0_i32_0 : i32
    scf.if %2 {
      %c0_8 = arith.constant 0 : index
      %c0_9 = arith.constant 0 : index
      %9 = vector.load %arg3[%c0_8, %c0_9] : memref<1x5xf32, #tpu.memory_space<vmem>>, vector<1x5xf32>
      %10 = vector.shape_cast %9 : vector<1x5xf32> to vector<1x5xf32>
      %11 = vector.broadcast %10 : vector<1x5xf32> to vector<5x5xf32>
      %c0_10 = arith.constant 0 : index
      %c0_11 = arith.constant 0 : index
      %12 = vector.load %arg4[%c0_10, %c0_11] : memref<5x5xf32, #tpu.memory_space<vmem>>, vector<5x5xf32>
      tpu.vector_store %arg4[%c0_10, %c0_11], %11 {strides = array<i32>} : memref<5x5xf32, #tpu.memory_space<vmem>>, vector<5x5xf32>,
    } else {
    }
    %c0 = arith.constant 0 : index
    %c0_1 = arith.constant 0 : index
    %3 = vector.load %arg4[%c0, %c0_1] : memref<5x5xf32, #tpu.memory_space<vmem>>, vector<5x5xf32>
    %c0_2 = arith.constant 0 : index
    %c0_3 = arith.constant 0 : index
    %4 = vector.load %arg1[%c0_2, %c0_3] : memref<5x512xf32, #tpu.memory_space<vmem>>, vector<5x512xf32>
    %c0_4 = arith.constant 0 : index
    %c0_5 = arith.constant 0 : index
    %5 = vector.load %arg2[%c0_4, %c0_5] : memref<5x512xf32, #tpu.memory_space<vmem>>, vector<5x512xf32>
    %cst = arith.constant dense<0.000000e+00> : vector<5x5xf32>
    %6 = tpu.matmul %4, %5, %cst {dimension_numbers = #tpu.dot_dimension_numbers<[1], [1], [0], [0], [0, 0, 1, 0], [], []>} : vector<5x512xf32>, vector<5x512xf32>, vector<5x5xf32> -> vector<5x5xf32>
    %7 = arith.addf %3, %6 : vector<5x5xf32>
    %c0_6 = arith.constant 0 : index
    %c0_7 = arith.constant 0 : index
    %8 = vector.load %arg4[%c0_6, %c0_7] : memref<5x5xf32, #tpu.memory_space<vmem>>, vector<5x5xf32>
    tpu.vector_store %arg4[%c0_6, %c0_7], %7 {strides = array<i32>} : memref<5x5xf32, #tpu.memory_space<vmem>>, vector<5x5xf32>,
    return
  }
  func.func @transform_0(%arg0: i32) -> (i32, i32) {
    %c0_i32 = arith.constant 0 : i32
    %c0_i32_0 = arith.constant 0 : i32
    return %c0_i32, %arg0 : i32, i32
  }
  func.func @transform_1(%arg0: i32) -> (i32, i32) {
    %c0_i32 = arith.constant 0 : i32
    %c0_i32_0 = arith.constant 0 : i32
    return %c0_i32, %arg0 : i32, i32
  }
  func.func @transform_2(%arg0: i32) -> (i32, i32) {
    %c0_i32 = arith.constant 0 : i32
    %c0_i32_0 = arith.constant 0 : i32
    %c0_i32_1 = arith.constant 0 : i32
    return %c0_i32, %c0_i32_0 : i32, i32
  }
  func.func @transform_3(%arg0: i32) -> (i32, i32) {
    %c0_i32 = arith.constant 0 : i32
    %c0_i32_0 = arith.constant 0 : i32
    %c0_i32_1 = arith.constant 0 : i32
    return %c0_i32, %c0_i32_0 : i32, i32
  }
}

</mosaic_0001>

<bundles_post_ra>
// kernel: linear_pallas.1
= control target key start
LH: loop header
LB: loop body
LE: loop exit
PB: predicated region body
PF: predicated region fallthrough
CT: control target
= control target key end

     0   :  { %8 = vsyncpa [#allocation3], 0  ;;  %s282_s0 = inlined_call_operand.hbm [shape: f32[5,512], index: 0, kind: input, shape index: {}]   ;;  %s283_s1 = inlined_call_operand.hbm [shape: f32[5,512], index: 1, kind: input, shape index: {}]   ;;  %s284_s2 = inlined_call_operand.vmem [shape: f32[1,5], index: 2, kind: input, shape index: {}]   ;;  %s285_s3 = inlined_call_operand.hbm [shape: f32[5,5], index: 3, kind: output, shape index: {}]  }
   0x1   :  { %9 = vsyncpa [#allocation6], 0 }
   0x2   :  { %10 = vsyncpa [#allocation4], 0  ;;  %s16_s14 = sshll.u32 %s282_s0, 4  ;;  %s245_s15 = smov [#allocation2]   ;;  %s17_s14 = int_to_ptr.hbm [resolvable:$true] %s16_s14 }
   0x3   :  { %s18_s16 = sshll.u32 %s245_s15, 4  ;;  %s27_s19 = sshll.u32 %s283_s1, 4  ;;  %s19_s16 = int_to_ptr.vmem [resolvable:$true] %s18_s16  ;;  %s28_s19 = int_to_ptr.hbm [resolvable:$true] %s27_s19 }
   0x4   :  { %21 = dma.hbm_to_vmem [thread:$0]  %s17_s14, 512, %s19_s16, [#allocation3]  }
   0x5   :  { %s246_s20 = smov [#allocation5]  }
   0x6   :  { %s29_s21 = sshll.u32 %s246_s20, 4  ;;  %s30_s21 = int_to_ptr.vmem [resolvable:$true] %s29_s21 }
   0x7   :  { %32 = dma.hbm_to_vmem [thread:$0]  %s28_s19, 512, %s30_s21, [#allocation6]  }
   0x8   :  { %239 = dma.done.wait [#allocation3], 512  }
   0x9   :  { %240 = vsyncadd [#allocation3], 4294966784 }
   0xa   :  { %241 = dma.done.wait [#allocation6], 512  }
   0xb   :  { %242 = vsyncadd [#allocation6], 4294966784  ;;  %v60_v0 = vld [vmem:[#allocation5 + $0x10] sm:$0x1f]  ;;  %v61_v1 = vld [vmem:[#allocation5 + $0x18] sm:$0x1f] }
   0xc   :  { %v56_v2 = vld [vmem:[#allocation2 + $0x10] sm:$0x1f]  ;;  %117 = vmatpush.xpose.msra.mxu2 %v60_v0  ;;  %137 = vmatpush.xpose.msra.mxu3 %v61_v1  ;;  %v58_v3 = vld [vmem:[#allocation5] sm:$0x1f]  ;;  %v59_v4 = vld [vmem:[#allocation5 + $0x8] sm:$0x1f] }
   0xd   :  { %v57_v5 = vld [vmem:[#allocation2 + $0x18] sm:$0x1f]  ;;  %77 = vmatpush.xpose.msra.mxu0 %v58_v3  ;;  %97 = vmatpush.xpose.msra.mxu1 %v59_v4  ;;  %v54_v6 = vld [vmem:[#allocation2] sm:$0x1f]  ;;  %v55_v7 = vld [vmem:[#allocation2 + $0x8] sm:$0x1f] }
   0xe   :  { %v166_v8 = vld [vmem:[%s284_s2] ss:$0 sm:$0xff]  ;;  %vm51_vm0 = vcmask 36864   ;;  %s247_s22 = smov [#allocation7]   ;;  %s152_s26 = sshll.u32 %s285_s3, 4  ;;  %s153_s26 = int_to_ptr.hbm [resolvable:$true] %s152_s26 }
   0xf   :  { %118 = vmatmul.f32.vlgmr.msra.gmra.mxu2 %v56_v2  ;;  %138 = vmatmul.f32.vlgmr.msra.gmra.mxu3 %v57_v5  ;;  %52 = vst.msk [vmem:[#allocation7] sm:$0x1f] %vm51_vm0, %v166_v8  ;;  %s150_s23 = sshll.u32 %s247_s22, 4  ;;  %s151_s23 = int_to_ptr.vmem [resolvable:$true] %s150_s23 }
  0x10   :  { %78 = vmatmul.f32.vlgmr.msra.gmra.mxu0 %v54_v6  ;;  %98 = vmatmul.f32.vlgmr.msra.gmra.mxu1 %v55_v7 }
  0x16   :  { %v53_v15 = vld [vmem:[#allocation7] sm:$0x1f] }
  0x8d   :  { %v79_v9 = vpop.f32.mrf.mxu0  ;;  %v99_v10 = vpop.f32.mrf.mxu1 }
  0x8e   :  { %v100_v11 = vadd.f32 %v99_v10, %v79_v9 }
  0x92   :  { %v119_v12 = vpop.f32.mrf.mxu2  ;;  %v139_v13 = vpop.f32.mrf.mxu3 }
  0x93   :  { %v120_v14 = vadd.f32 %v119_v12, %v100_v11 }
  0x95   :  { %v140_v16 = vadd.f32 %v139_v13, %v120_v14 }
  0x97   :  { %v142_v17 = vadd.f32 %v140_v16, %v53_v15 }
  0x99   :  { %144 = vst.msk [vmem:[#allocation7] sm:$0x1f] %vm51_vm0, %v142_v17 }
  0x9a   :  { %155 = dma.vmem_to_hbm [thread:$0]  %s151_s23, 128, %s153_s26, [#allocation4]  }
  0x9b   :  { %243 = dma.done.wait [#allocation4], 128  }
  0x9c   :  { %244 = vsyncadd [#allocation4], 4294967168 }
  0x9d   :  { %160 = vsyncpa [#allocation3], 1 }
  0x9e   :  { %161 = vsyncpa [#allocation6], 1 }
  0x9f   :  { %162 = vsyncpa [#allocation4], 1 }

</bundles_post_ra>
